<compile_context>
chip_gen: v5e
topology: v5e:2x2
jax: 0.10.0
libtpu: 0.0.40
codegen_flags: <defaults>
</compile_context>

<pallas_src>
import jax
import jax.numpy as jnp
from jax.experimental import pallas as pl
from jax.experimental.pallas import tpu as pltpu

MAX_COUNT = 5               # self.count in the PyTorch module
MAX_WIDTH = 3               # self.width in the PyTorch module
LANE = 128                  # vreg lane width
SUBLANE = 8                 # f32 sublane tile
MAX_TILE_BYTES = 6 * 1024 * 1024   # per pipeline buffer; 4 buffers ~= 24 MiB total
VMEM_LIMIT_BYTES = 48 * 1024 * 1024  # raise scoped VMEM limit (< 64 MiB v7x physical)


def _round_up(x: int, m: int) -> int:
    return ((x + m - 1) // m) * m


def _choose_tiling(H: int, W_pad: int):
    """Pick (tile_h, H_pad) so 4 pipeline buffers stay under ~24 MiB."""
    row_bytes = W_pad * 4
    max_rows = max(SUBLANE, (MAX_TILE_BYTES // row_bytes) // SUBLANE * SUBLANE)
    h_ceil = _round_up(H, SUBLANE)
    n_tiles = max(1, -(-h_ceil // max_rows))          # ceil div
    if n_tiles == 1 and h_ceil >= 2 * SUBLANE:
        n_tiles = 2                                   # give v7x's 2nd TC work
    tile_h = _round_up(-(-h_ceil // n_tiles), SUBLANE)
    return tile_h, tile_h * n_tiles                   # (tile_h, H_pad)


def _stroke_kernel(params_ref, img_ref, out_ref):
    """Paint up to MAX_COUNT strokes onto one (tile_h, W_pad) row-tile.

    params_ref : SMEM f32[MAX_COUNT, 8]  rows = [x0, y0, x1, y1, width, fill, active, pad]
    img_ref    : VMEM f32[tile_h, W_pad] input image tile
    out_ref    : VMEM f32[tile_h, W_pad] output image tile (carries the paint state)
    """
    th, w = out_ref.shape
    row0 = (pl.program_id(0) * th).astype(jnp.float32)
    # Pixel-center coordinates of this tile (PIL convention: x = column, y = row).
    # int32 iota + one astype per tile (kept for lowering robustness; 2 converts
    # per grid step is noise next to the per-stroke vector work).
    ys = jax.lax.broadcasted_iota(jnp.int32, (th, w), 0).astype(jnp.float32) + row0
    xs = jax.lax.broadcasted_iota(jnp.int32, (th, w), 1).astype(jnp.float32)

    # The painted image lives in out_ref; strokes are applied sequentially
    # (later strokes overwrite earlier ones), like successive ImageDraw.line calls.
    out_ref[...] = img_ref[...]

    for k in range(MAX_COUNT):
        x0 = params_ref[k, 0]
        y0 = params_ref[k, 1]
        x1 = params_ref[k, 2]
        y1 = params_ref[k, 3]
        half = params_ref[k, 4] * 0.5
        fill = params_ref[k, 5]
        active = params_ref[k, 6]

        # Scalar geometry (SMEM scalars -> scalar unit, not the VPU).
        dx = x1 - x0
        dy = y1 - y0
        len2 = dx * dx + dy * dy
        inv_len2 = 1.0 / jnp.maximum(len2, 1e-6)      # scalar reciprocal
        half2 = half * half

        # Cull strokes that are inactive or whose y-band misses this row tile.
        y_lo = jnp.minimum(y0, y1) - half
        y_hi = jnp.maximum(y0, y1) + half
        hits_tile = (y_hi >= row0) & (y_lo <= row0 + float(th - 1))
        pred = (active > 0.5) & hits_tile

        @pl.when(pred)
        def _():
            px = xs - x0
            py = ys - y0
            # Closest point on the segment (clamped projection).
            t = jnp.clip((px * dx + py * dy) * inv_len2, 0.0, 1.0)
            ddx = px - t * dx
            ddy = py - t * dy
            dist2 = ddx * ddx + ddy * ddy
            mask = dist2 <= half2
            out_ref[...] = jnp.where(mask, fill, out_ref[...])


def _paint_strokes(image_2d: jax.Array, params: jax.Array) -> jax.Array:
    """Run the Pallas kernel over the full (H, W) image."""
    H, W = image_2d.shape
    W_pad = _round_up(W, LANE)
    tile_h, H_pad = _choose_tiling(H, W_pad)
    padded = jnp.pad(image_2d.astype(jnp.float32),
                     ((0, H_pad - H), (0, W_pad - W)))

    out = pl.pallas_call(
        _stroke_kernel,
        out_shape=jax.ShapeDtypeStruct((H_pad, W_pad), jnp.float32),
        grid=(H_pad // tile_h,),
        in_specs=[
            pl.BlockSpec(memory_space=pltpu.MemorySpace.SMEM),   # stroke params
            pl.BlockSpec((tile_h, W_pad), lambda i: (i, 0)),     # image row-tile
        ],
        out_specs=pl.BlockSpec((tile_h, W_pad), lambda i: (i, 0)),
        input_output_aliases={1: 0},   # image fully overwritten -> reuse its HBM
        compiler_params=pltpu.CompilerParams(
            dimension_semantics=("parallel",),
            vmem_limit_bytes=VMEM_LIMIT_BYTES,
        ),
    )(params, padded)
    return out[:H, :W]


def random_stroke(image: jax.Array, boxes: jax.Array, key: jax.Array,
                  count: int = MAX_COUNT, width: int = MAX_WIDTH):
    """JAX equivalent of RandomStroke.forward((image, boxes)).

    image : (1, H, W) float32 ("F"-mode single-channel image)
    boxes : passed through untouched
    """
    assert image.ndim == 3 and image.shape[0] == 1
    _, H, W = image.shape

    kc, kx0, ky0, kx1, ky1, kw, kf = jax.random.split(key, 7)
    # random.randint bounds are inclusive -> maxval is exclusive here.
    n_active = jax.random.randint(kc, (), 1, count + 1)                 # count strokes
    x0 = jax.random.randint(kx0, (count,), 0, W + 1).astype(jnp.float32)
    y0 = jax.random.randint(ky0, (count,), 0, H + 1).astype(jnp.float32)
    x1 = jax.random.randint(kx1, (count,), 0, W + 1).astype(jnp.float32)
    y1 = jax.random.randint(ky1, (count,), 0, H + 1).astype(jnp.float32)
    wd = jax.random.randint(kw, (count,), 1, width + 1).astype(jnp.float32)
    fl = jax.random.randint(kf, (count,), 0, 256).astype(jnp.float32)   # fill 0..255
    active = (jnp.arange(count) < n_active).astype(jnp.float32)
    pad = jnp.zeros((count,), jnp.float32)

    params = jnp.stack([x0, y0, x1, y1, wd, fl, active, pad], axis=1)   # (count, 8)

    out_2d = _paint_strokes(image[0].astype(jnp.float32), params)
    return out_2d[None, :, :], boxes


if __name__ == "__main__":
    key = jax.random.PRNGKey(0)
    k_img, k_box, k_strokes = jax.random.split(key, 3)

    H, W = 16, 16
    image = jax.random.uniform(k_img, (1, H, W), jnp.float32) * 255.0   # "F"-mode image
    boxes = jax.random.uniform(k_box, (3, 4), jnp.float32) * float(W)   # dummy bboxes

    out_image, out_boxes = random_stroke(image, boxes, k_strokes)
    jax.block_until_ready(out_image)
    jax.block_until_ready(out_boxes)

    assert out_image.shape == (1, H, W) and out_image.dtype == jnp.float32
    assert out_boxes.shape == boxes.shape
    print("KERNEL_OK")
</pallas_src>

<mosaic_0001>
module attributes {stable_mosaic.version = 11 : i64} {
  func.func @_stroke_kernel(%arg0: i32, %arg1: memref<5x8xf32, #tpu.memory_space<smem>>, %arg2: memref<8x128xf32, #tpu.memory_space<vmem>>, %arg3: memref<8x128xf32, #tpu.memory_space<vmem>>) attributes {dimension_semantics = [#tpu.dimension_semantics<parallel>], iteration_bounds = array<i64: 2>, scalar_prefetch = 0 : i64, scratch_operands = 0 : i64, tpu.core_type = #tpu.core_type<tc>, window_params = [{transform_indices = @transform_0, window_bounds = array<i64: 5, 8>}, {transform_indices = @transform_1, window_bounds = array<i64: 8, 128>}, {transform_indices = @transform_2, window_bounds = array<i64: 8, 128>}]} {
    %c8_i32 = arith.constant 8 : i32
    %0 = arith.muli %arg0, %c8_i32 : i32
    %1 = arith.sitofp %0 : i32 to f32
    %2 = tpu.iota {dimensions = array<i32: 0>} : vector<8x128xi32>
    %3 = arith.sitofp %2 : vector<8x128xi32> to vector<8x128xf32>
    %4 = vector.broadcast %1 : f32 to vector<8x128xf32>
    %5 = arith.addf %3, %4 : vector<8x128xf32>
    %6 = tpu.iota {dimensions = array<i32: 1>} : vector<8x128xi32>
    %7 = arith.sitofp %6 : vector<8x128xi32> to vector<8x128xf32>
    %c0 = arith.constant 0 : index
    %c0_0 = arith.constant 0 : index
    %8 = vector.load %arg2[%c0, %c0_0] : memref<8x128xf32, #tpu.memory_space<vmem>>, vector<8x128xf32>
    %c0_1 = arith.constant 0 : index
    %c0_2 = arith.constant 0 : index
    %9 = vector.load %arg3[%c0_1, %c0_2] : memref<8x128xf32, #tpu.memory_space<vmem>>, vector<8x128xf32>
    tpu.vector_store %arg3[%c0_1, %c0_2], %8 {strides = array<i32>} : memref<8x128xf32, #tpu.memory_space<vmem>>, vector<8x128xf32>,
    %c0_3 = arith.constant 0 : index
    %c0_4 = arith.constant 0 : index
    %10 = memref.load %arg1[%c0_3, %c0_4] : memref<5x8xf32, #tpu.memory_space<smem>>
    %c0_5 = arith.constant 0 : index
    %c1 = arith.constant 1 : index
    %11 = memref.load %arg1[%c0_5, %c1] : memref<5x8xf32, #tpu.memory_space<smem>>
    %c0_6 = arith.constant 0 : index
    %c2 = arith.constant 2 : index
    %12 = memref.load %arg1[%c0_6, %c2] : memref<5x8xf32, #tpu.memory_space<smem>>
    %c0_7 = arith.constant 0 : index
    %c3 = arith.constant 3 : index
    %13 = memref.load %arg1[%c0_7, %c3] : memref<5x8xf32, #tpu.memory_space<smem>>
    %c0_8 = arith.constant 0 : index
    %c4 = arith.constant 4 : index
    %14 = memref.load %arg1[%c0_8, %c4] : memref<5x8xf32, #tpu.memory_space<smem>>
    %cst = arith.constant 5.000000e-01 : f32
    %15 = arith.mulf %14, %cst : f32
    %c0_9 = arith.constant 0 : index
    %c5 = arith.constant 5 : index
    %16 = memref.load %arg1[%c0_9, %c5] : memref<5x8xf32, #tpu.memory_space<smem>>
    %c0_10 = arith.constant 0 : index
    %c6 = arith.constant 6 : index
    %17 = memref.load %arg1[%c0_10, %c6] : memref<5x8xf32, #tpu.memory_space<smem>>
    %18 = arith.subf %12, %10 : f32
    %19 = arith.subf %13, %11 : f32
    %20 = arith.mulf %18, %18 : f32
    %21 = arith.mulf %19, %19 : f32
    %22 = arith.addf %20, %21 : f32
    %cst_11 = arith.constant 9.99999997E-7 : f32
    %23 = arith.maximumf %22, %cst_11 : f32
    %cst_12 = arith.constant 1.000000e+00 : f32
    %24 = arith.divf %cst_12, %23 : f32
    %25 = arith.mulf %15, %15 : f32
    %26 = arith.minimumf %11, %13 : f32
    %27 = arith.subf %26, %15 : f32
    %28 = arith.maximumf %11, %13 : f32
    %29 = arith.addf %28, %15 : f32
    %30 = arith.cmpf oge, %29, %1 : f32
    %cst_13 = arith.constant 7.000000e+00 : f32
    %31 = arith.addf %1, %cst_13 : f32
    %32 = arith.cmpf ole, %27, %31 : f32
    %33 = arith.andi %30, %32 : i1
    %cst_14 = arith.constant 5.000000e-01 : f32
    %34 = arith.cmpf ogt, %17, %cst_14 : f32
    %35 = arith.andi %34, %33 : i1
    %36 = arith.extui %35 : i1 to i32
    %c0_i32 = arith.constant 0 : i32
    %37 = arith.cmpi ne, %36, %c0_i32 : i32
    scf.if %37 {
      %150 = vector.broadcast %10 : f32 to vector<8x128xf32>
      %151 = arith.subf %7, %150 : vector<8x128xf32>
      %152 = vector.broadcast %11 : f32 to vector<8x128xf32>
      %153 = arith.subf %5, %152 : vector<8x128xf32>
      %154 = vector.broadcast %18 : f32 to vector<8x128xf32>
      %155 = arith.mulf %151, %154 : vector<8x128xf32>
      %156 = vector.broadcast %19 : f32 to vector<8x128xf32>
      %157 = arith.mulf %153, %156 : vector<8x128xf32>
      %158 = arith.addf %155, %157 : vector<8x128xf32>
      %159 = vector.broadcast %24 : f32 to vector<8x128xf32>
      %160 = arith.mulf %158, %159 : vector<8x128xf32>
      %cst_95 = arith.constant 0.000000e+00 : f32
      %cst_96 = arith.constant 1.000000e+00 : f32
      %161 = vector.broadcast %cst_95 : f32 to vector<8x128xf32>
      %162 = arith.maximumf %161, %160 : vector<8x128xf32>
      %163 = vector.broadcast %cst_96 : f32 to vector<8x128xf32>
      %164 = arith.minimumf %163, %162 : vector<8x128xf32>
      %165 = vector.broadcast %18 : f32 to vector<8x128xf32>
      %166 = arith.mulf %164, %165 : vector<8x128xf32>
      %167 = arith.subf %151, %166 : vector<8x128xf32>
      %168 = vector.broadcast %19 : f32 to vector<8x128xf32>
      %169 = arith.mulf %164, %168 : vector<8x128xf32>
      %170 = arith.subf %153, %169 : vector<8x128xf32>
      %171 = arith.mulf %167, %167 : vector<8x128xf32>
      %172 = arith.mulf %170, %170 : vector<8x128xf32>
      %173 = arith.addf %171, %172 : vector<8x128xf32>
      %174 = vector.broadcast %25 : f32 to vector<8x128xf32>
      %175 = arith.cmpf ole, %173, %174 : vector<8x128xf32>
      %c0_97 = arith.constant 0 : index
      %c0_98 = arith.constant 0 : index
      %176 = vector.load %arg3[%c0_97, %c0_98] : memref<8x128xf32, #tpu.memory_space<vmem>>, vector<8x128xf32>
      %177 = vector.broadcast %16 : f32 to vector<8x128xf32>
      %178 = arith.select %175, %177, %176 : vector<8x128xi1>, vector<8x128xf32>
      %c0_99 = arith.constant 0 : index
      %c0_100 = arith.constant 0 : index
      %179 = vector.load %arg3[%c0_99, %c0_100] : memref<8x128xf32, #tpu.memory_space<vmem>>, vector<8x128xf32>
      tpu.vector_store %arg3[%c0_99, %c0_100], %178 {strides = array<i32>} : memref<8x128xf32, #tpu.memory_space<vmem>>, vector<8x128xf32>,
    } else {
    }
    %c1_15 = arith.constant 1 : index
    %c0_16 = arith.constant 0 : index
    %38 = memref.load %arg1[%c1_15, %c0_16] : memref<5x8xf32, #tpu.memory_space<smem>>
    %c1_17 = arith.constant 1 : index
    %c1_18 = arith.constant 1 : index
    %39 = memref.load %arg1[%c1_17, %c1_18] : memref<5x8xf32, #tpu.memory_space<smem>>
    %c1_19 = arith.constant 1 : index
    %c2_20 = arith.constant 2 : index
    %40 = memref.load %arg1[%c1_19, %c2_20] : memref<5x8xf32, #tpu.memory_space<smem>>
    %c1_21 = arith.constant 1 : index
    %c3_22 = arith.constant 3 : index
    %41 = memref.load %arg1[%c1_21, %c3_22] : memref<5x8xf32, #tpu.memory_space<smem>>
    %c1_23 = arith.constant 1 : index
    %c4_24 = arith.constant 4 : index
    %42 = memref.load %arg1[%c1_23, %c4_24] : memref<5x8xf32, #tpu.memory_space<smem>>
    %cst_25 = arith.constant 5.000000e-01 : f32
    %43 = arith.mulf %42, %cst_25 : f32
    %c1_26 = arith.constant 1 : index
    %c5_27 = arith.constant 5 : index
    %44 = memref.load %arg1[%c1_26, %c5_27] : memref<5x8xf32, #tpu.memory_space<smem>>
    %c1_28 = arith.constant 1 : index
    %c6_29 = arith.constant 6 : index
    %45 = memref.load %arg1[%c1_28, %c6_29] : memref<5x8xf32, #tpu.memory_space<smem>>
    %46 = arith.subf %40, %38 : f32
    %47 = arith.subf %41, %39 : f32
    %48 = arith.mulf %46, %46 : f32
    %49 = arith.mulf %47, %47 : f32
    %50 = arith.addf %48, %49 : f32
    %cst_30 = arith.constant 9.99999997E-7 : f32
    %51 = arith.maximumf %50, %cst_30 : f32
    %cst_31 = arith.constant 1.000000e+00 : f32
    %52 = arith.divf %cst_31, %51 : f32
    %53 = arith.mulf %43, %43 : f32
    %54 = arith.minimumf %39, %41 : f32
    %55 = arith.subf %54, %43 : f32
    %56 = arith.maximumf %39, %41 : f32
    %57 = arith.addf %56, %43 : f32
    %58 = arith.cmpf oge, %57, %1 : f32
    %cst_32 = arith.constant 7.000000e+00 : f32
    %59 = arith.addf %1, %cst_32 : f32
    %60 = arith.cmpf ole, %55, %59 : f32
    %61 = arith.andi %58, %60 : i1
    %cst_33 = arith.constant 5.000000e-01 : f32
    %62 = arith.cmpf ogt, %45, %cst_33 : f32
    %63 = arith.andi %62, %61 : i1
    %64 = arith.extui %63 : i1 to i32
    %c0_i32_34 = arith.constant 0 : i32
    %65 = arith.cmpi ne, %64, %c0_i32_34 : i32
    scf.if %65 {
      %150 = vector.broadcast %38 : f32 to vector<8x128xf32>
      %151 = arith.subf %7, %150 : vector<8x128xf32>
      %152 = vector.broadcast %39 : f32 to vector<8x128xf32>
      %153 = arith.subf %5, %152 : vector<8x128xf32>
      %154 = vector.broadcast %46 : f32 to vector<8x128xf32>
      %155 = arith.mulf %151, %154 : vector<8x128xf32>
      %156 = vector.broadcast %47 : f32 to vector<8x128xf32>
      %157 = arith.mulf %153, %156 : vector<8x128xf32>
      %158 = arith.addf %155, %157 : vector<8x128xf32>
      %159 = vector.broadcast %52 : f32 to vector<8x128xf32>
      %160 = arith.mulf %158, %159 : vector<8x128xf32>
      %cst_95 = arith.constant 0.000000e+00 : f32
      %cst_96 = arith.constant 1.000000e+00 : f32
      %161 = vector.broadcast %cst_95 : f32 to vector<8x128xf32>
      %162 = arith.maximumf %161, %160 : vector<8x128xf32>
      %163 = vector.broadcast %cst_96 : f32 to vector<8x128xf32>
      %164 = arith.minimumf %163, %162 : vector<8x128xf32>
      %165 = vector.broadcast %46 : f32 to vector<8x128xf32>
      %166 = arith.mulf %164, %165 : vector<8x128xf32>
      %167 = arith.subf %151, %166 : vector<8x128xf32>
      %168 = vector.broadcast %47 : f32 to vector<8x128xf32>
      %169 = arith.mulf %164, %168 : vector<8x128xf32>
      %170 = arith.subf %153, %169 : vector<8x128xf32>
      %171 = arith.mulf %167, %167 : vector<8x128xf32>
      %172 = arith.mulf %170, %170 : vector<8x128xf32>
      %173 = arith.addf %171, %172 : vector<8x128xf32>
      %174 = vector.broadcast %53 : f32 to vector<8x128xf32>
      %175 = arith.cmpf ole, %173, %174 : vector<8x128xf32>
      %c0_97 = arith.constant 0 : index
      %c0_98 = arith.constant 0 : index
      %176 = vector.load %arg3[%c0_97, %c0_98] : memref<8x128xf32, #tpu.memory_space<vmem>>, vector<8x128xf32>
      %177 = vector.broadcast %44 : f32 to vector<8x128xf32>
      %178 = arith.select %175, %177, %176 : vector<8x128xi1>, vector<8x128xf32>
      %c0_99 = arith.constant 0 : index
      %c0_100 = arith.constant 0 : index
      %179 = vector.load %arg3[%c0_99, %c0_100] : memref<8x128xf32, #tpu.memory_space<vmem>>, vector<8x128xf32>
      tpu.vector_store %arg3[%c0_99, %c0_100], %178 {strides = array<i32>} : memref<8x128xf32, #tpu.memory_space<vmem>>, vector<8x128xf32>,
    } else {
    }
    %c2_35 = arith.constant 2 : index
    %c0_36 = arith.constant 0 : index
    %66 = memref.load %arg1[%c2_35, %c0_36] : memref<5x8xf32, #tpu.memory_space<smem>>
    %c2_37 = arith.constant 2 : index
    %c1_38 = arith.constant 1 : index
    %67 = memref.load %arg1[%c2_37, %c1_38] : memref<5x8xf32, #tpu.memory_space<smem>>
    %c2_39 = arith.constant 2 : index
    %c2_40 = arith.constant 2 : index
    %68 = memref.load %arg1[%c2_39, %c2_40] : memref<5x8xf32, #tpu.memory_space<smem>>
    %c2_41 = arith.constant 2 : index
    %c3_42 = arith.constant 3 : index
    %69 = memref.load %arg1[%c2_41, %c3_42] : memref<5x8xf32, #tpu.memory_space<smem>>
    %c2_43 = arith.constant 2 : index
    %c4_44 = arith.constant 4 : index
    %70 = memref.load %arg1[%c2_43, %c4_44] : memref<5x8xf32, #tpu.memory_space<smem>>
    %cst_45 = arith.constant 5.000000e-01 : f32
    %71 = arith.mulf %70, %cst_45 : f32
    %c2_46 = arith.constant 2 : index
    %c5_47 = arith.constant 5 : index
    %72 = memref.load %arg1[%c2_46, %c5_47] : memref<5x8xf32, #tpu.memory_space<smem>>
    %c2_48 = arith.constant 2 : index
    %c6_49 = arith.constant 6 : index
    %73 = memref.load %arg1[%c2_48, %c6_49] : memref<5x8xf32, #tpu.memory_space<smem>>
    %74 = arith.subf %68, %66 : f32
    %75 = arith.subf %69, %67 : f32
    %76 = arith.mulf %74, %74 : f32
    %77 = arith.mulf %75, %75 : f32
    %78 = arith.addf %76, %77 : f32
    %cst_50 = arith.constant 9.99999997E-7 : f32
    %79 = arith.maximumf %78, %cst_50 : f32
    %cst_51 = arith.constant 1.000000e+00 : f32
    %80 = arith.divf %cst_51, %79 : f32
    %81 = arith.mulf %71, %71 : f32
    %82 = arith.minimumf %67, %69 : f32
    %83 = arith.subf %82, %71 : f32
    %84 = arith.maximumf %67, %69 : f32
    %85 = arith.addf %84, %71 : f32
    %86 = arith.cmpf oge, %85, %1 : f32
    %cst_52 = arith.constant 7.000000e+00 : f32
    %87 = arith.addf %1, %cst_52 : f32
    %88 = arith.cmpf ole, %83, %87 : f32
    %89 = arith.andi %86, %88 : i1
    %cst_53 = arith.constant 5.000000e-01 : f32
    %90 = arith.cmpf ogt, %73, %cst_53 : f32
    %91 = arith.andi %90, %89 : i1
    %92 = arith.extui %91 : i1 to i32
    %c0_i32_54 = arith.constant 0 : i32
    %93 = arith.cmpi ne, %92, %c0_i32_54 : i32
    scf.if %93 {
      %150 = vector.broadcast %66 : f32 to vector<8x128xf32>
      %151 = arith.subf %7, %150 : vector<8x128xf32>
      %152 = vector.broadcast %67 : f32 to vector<8x128xf32>
      %153 = arith.subf %5, %152 : vector<8x128xf32>
      %154 = vector.broadcast %74 : f32 to vector<8x128xf32>
      %155 = arith.mulf %151, %154 : vector<8x128xf32>
      %156 = vector.broadcast %75 : f32 to vector<8x128xf32>
      %157 = arith.mulf %153, %156 : vector<8x128xf32>
      %158 = arith.addf %155, %157 : vector<8x128xf32>
      %159 = vector.broadcast %80 : f32 to vector<8x128xf32>
      %160 = arith.mulf %158, %159 : vector<8x128xf32>
      %cst_95 = arith.constant 0.000000e+00 : f32
      %cst_96 = arith.constant 1.000000e+00 : f32
      %161 = vector.broadcast %cst_95 : f32 to vector<8x128xf32>
      %162 = arith.maximumf %161, %160 : vector<8x128xf32>
      %163 = vector.broadcast %cst_96 : f32 to vector<8x128xf32>
      %164 = arith.minimumf %163, %162 : vector<8x128xf32>
      %165 = vector.broadcast %74 : f32 to vector<8x128xf32>
      %166 = arith.mulf %164, %165 : vector<8x128xf32>
      %167 = arith.subf %151, %166 : vector<8x128xf32>
      %168 = vector.broadcast %75 : f32 to vector<8x128xf32>
      %169 = arith.mulf %164, %168 : vector<8x128xf32>
      %170 = arith.subf %153, %169 : vector<8x128xf32>
      %171 = arith.mulf %167, %167 : vector<8x128xf32>
      %172 = arith.mulf %170, %170 : vector<8x128xf32>
      %173 = arith.addf %171, %172 : vector<8x128xf32>
      %174 = vector.broadcast %81 : f32 to vector<8x128xf32>
      %175 = arith.cmpf ole, %173, %174 : vector<8x128xf32>
      %c0_97 = arith.constant 0 : index
      %c0_98 = arith.constant 0 : index
      %176 = vector.load %arg3[%c0_97, %c0_98] : memref<8x128xf32, #tpu.memory_space<vmem>>, vector<8x128xf32>
      %177 = vector.broadcast %72 : f32 to vector<8x128xf32>
      %178 = arith.select %175, %177, %176 : vector<8x128xi1>, vector<8x128xf32>
      %c0_99 = arith.constant 0 : index
      %c0_100 = arith.constant 0 : index
      %179 = vector.load %arg3[%c0_99, %c0_100] : memref<8x128xf32, #tpu.memory_space<vmem>>, vector<8x128xf32>
      tpu.vector_store %arg3[%c0_99, %c0_100], %178 {strides = array<i32>} : memref<8x128xf32, #tpu.memory_space<vmem>>, vector<8x128xf32>,
    } else {
    }
    %c3_55 = arith.constant 3 : index
    %c0_56 = arith.constant 0 : index
    %94 = memref.load %arg1[%c3_55, %c0_56] : memref<5x8xf32, #tpu.memory_space<smem>>
    %c3_57 = arith.constant 3 : index
    %c1_58 = arith.constant 1 : index
    %95 = memref.load %arg1[%c3_57, %c1_58] : memref<5x8xf32, #tpu.memory_space<smem>>
    %c3_59 = arith.constant 3 : index
    %c2_60 = arith.constant 2 : index
    %96 = memref.load %arg1[%c3_59, %c2_60] : memref<5x8xf32, #tpu.memory_space<smem>>
    %c3_61 = arith.constant 3 : index
    %c3_62 = arith.constant 3 : index
    %97 = memref.load %arg1[%c3_61, %c3_62] : memref<5x8xf32, #tpu.memory_space<smem>>
    %c3_63 = arith.constant 3 : index
    %c4_64 = arith.constant 4 : index
    %98 = memref.load %arg1[%c3_63, %c4_64] : memref<5x8xf32, #tpu.memory_space<smem>>
    %cst_65 = arith.constant 5.000000e-01 : f32
    %99 = arith.mulf %98, %cst_65 : f32
    %c3_66 = arith.constant 3 : index
    %c5_67 = arith.constant 5 : index
    %100 = memref.load %arg1[%c3_66, %c5_67] : memref<5x8xf32, #tpu.memory_space<smem>>
    %c3_68 = arith.constant 3 : index
    %c6_69 = arith.constant 6 : index
    %101 = memref.load %arg1[%c3_68, %c6_69] : memref<5x8xf32, #tpu.memory_space<smem>>
    %102 = arith.subf %96, %94 : f32
    %103 = arith.subf %97, %95 : f32
    %104 = arith.mulf %102, %102 : f32
    %105 = arith.mulf %103, %103 : f32
    %106 = arith.addf %104, %105 : f32
    %cst_70 = arith.constant 9.99999997E-7 : f32
    %107 = arith.maximumf %106, %cst_70 : f32
    %cst_71 = arith.constant 1.000000e+00 : f32
    %108 = arith.divf %cst_71, %107 : f32
    %109 = arith.mulf %99, %99 : f32
    %110 = arith.minimumf %95, %97 : f32
    %111 = arith.subf %110, %99 : f32
    %112 = arith.maximumf %95, %97 : f32
    %113 = arith.addf %112, %99 : f32
    %114 = arith.cmpf oge, %113, %1 : f32
    %cst_72 = arith.constant 7.000000e+00 : f32
    %115 = arith.addf %1, %cst_72 : f32
    %116 = arith.cmpf ole, %111, %115 : f32
    %117 = arith.andi %114, %116 : i1
    %cst_73 = arith.constant 5.000000e-01 : f32
    %118 = arith.cmpf ogt, %101, %cst_73 : f32
    %119 = arith.andi %118, %117 : i1
    %120 = arith.extui %119 : i1 to i32
    %c0_i32_74 = arith.constant 0 : i32
    %121 = arith.cmpi ne, %120, %c0_i32_74 : i32
    scf.if %121 {
      %150 = vector.broadcast %94 : f32 to vector<8x128xf32>
      %151 = arith.subf %7, %150 : vector<8x128xf32>
      %152 = vector.broadcast %95 : f32 to vector<8x128xf32>
      %153 = arith.subf %5, %152 : vector<8x128xf32>
      %154 = vector.broadcast %102 : f32 to vector<8x128xf32>
      %155 = arith.mulf %151, %154 : vector<8x128xf32>
      %156 = vector.broadcast %103 : f32 to vector<8x128xf32>
      %157 = arith.mulf %153, %156 : vector<8x128xf32>
      %158 = arith.addf %155, %157 : vector<8x128xf32>
      %159 = vector.broadcast %108 : f32 to vector<8x128xf32>
      %160 = arith.mulf %158, %159 : vector<8x128xf32>
      %cst_95 = arith.constant 0.000000e+00 : f32
      %cst_96 = arith.constant 1.000000e+00 : f32
      %161 = vector.broadcast %cst_95 : f32 to vector<8x128xf32>
      %162 = arith.maximumf %161, %160 : vector<8x128xf32>
      %163 = vector.broadcast %cst_96 : f32 to vector<8x128xf32>
      %164 = arith.minimumf %163, %162 : vector<8x128xf32>
      %165 = vector.broadcast %102 : f32 to vector<8x128xf32>
      %166 = arith.mulf %164, %165 : vector<8x128xf32>
      %167 = arith.subf %151, %166 : vector<8x128xf32>
      %168 = vector.broadcast %103 : f32 to vector<8x128xf32>
      %169 = arith.mulf %164, %168 : vector<8x128xf32>
      %170 = arith.subf %153, %169 : vector<8x128xf32>
      %171 = arith.mulf %167, %167 : vector<8x128xf32>
      %172 = arith.mulf %170, %170 : vector<8x128xf32>
      %173 = arith.addf %171, %172 : vector<8x128xf32>
      %174 = vector.broadcast %109 : f32 to vector<8x128xf32>
      %175 = arith.cmpf ole, %173, %174 : vector<8x128xf32>
      %c0_97 = arith.constant 0 : index
      %c0_98 = arith.constant 0 : index
      %176 = vector.load %arg3[%c0_97, %c0_98] : memref<8x128xf32, #tpu.memory_space<vmem>>, vector<8x128xf32>
      %177 = vector.broadcast %100 : f32 to vector<8x128xf32>
      %178 = arith.select %175, %177, %176 : vector<8x128xi1>, vector<8x128xf32>
      %c0_99 = arith.constant 0 : index
      %c0_100 = arith.constant 0 : index
      %179 = vector.load %arg3[%c0_99, %c0_100] : memref<8x128xf32, #tpu.memory_space<vmem>>, vector<8x128xf32>
      tpu.vector_store %arg3[%c0_99, %c0_100], %178 {strides = array<i32>} : memref<8x128xf32, #tpu.memory_space<vmem>>, vector<8x128xf32>,
    } else {
    }
    %c4_75 = arith.constant 4 : index
    %c0_76 = arith.constant 0 : index
    %122 = memref.load %arg1[%c4_75, %c0_76] : memref<5x8xf32, #tpu.memory_space<smem>>
    %c4_77 = arith.constant 4 : index
    %c1_78 = arith.constant 1 : index
    %123 = memref.load %arg1[%c4_77, %c1_78] : memref<5x8xf32, #tpu.memory_space<smem>>
    %c4_79 = arith.constant 4 : index
    %c2_80 = arith.constant 2 : index
    %124 = memref.load %arg1[%c4_79, %c2_80] : memref<5x8xf32, #tpu.memory_space<smem>>
    %c4_81 = arith.constant 4 : index
    %c3_82 = arith.constant 3 : index
    %125 = memref.load %arg1[%c4_81, %c3_82] : memref<5x8xf32, #tpu.memory_space<smem>>
    %c4_83 = arith.constant 4 : index
    %c4_84 = arith.constant 4 : index
    %126 = memref.load %arg1[%c4_83, %c4_84] : memref<5x8xf32, #tpu.memory_space<smem>>
    %cst_85 = arith.constant 5.000000e-01 : f32
    %127 = arith.mulf %126, %cst_85 : f32
    %c4_86 = arith.constant 4 : index
    %c5_87 = arith.constant 5 : index
    %128 = memref.load %arg1[%c4_86, %c5_87] : memref<5x8xf32, #tpu.memory_space<smem>>
    %c4_88 = arith.constant 4 : index
    %c6_89 = arith.constant 6 : index
    %129 = memref.load %arg1[%c4_88, %c6_89] : memref<5x8xf32, #tpu.memory_space<smem>>
    %130 = arith.subf %124, %122 : f32
    %131 = arith.subf %125, %123 : f32
    %132 = arith.mulf %130, %130 : f32
    %133 = arith.mulf %131, %131 : f32
    %134 = arith.addf %132, %133 : f32
    %cst_90 = arith.constant 9.99999997E-7 : f32
    %135 = arith.maximumf %134, %cst_90 : f32
    %cst_91 = arith.constant 1.000000e+00 : f32
    %136 = arith.divf %cst_91, %135 : f32
    %137 = arith.mulf %127, %127 : f32
    %138 = arith.minimumf %123, %125 : f32
    %139 = arith.subf %138, %127 : f32
    %140 = arith.maximumf %123, %125 : f32
    %141 = arith.addf %140, %127 : f32
    %142 = arith.cmpf oge, %141, %1 : f32
    %cst_92 = arith.constant 7.000000e+00 : f32
    %143 = arith.addf %1, %cst_92 : f32
    %144 = arith.cmpf ole, %139, %143 : f32
    %145 = arith.andi %142, %144 : i1
    %cst_93 = arith.constant 5.000000e-01 : f32
    %146 = arith.cmpf ogt, %129, %cst_93 : f32
    %147 = arith.andi %146, %145 : i1
    %148 = arith.extui %147 : i1 to i32
    %c0_i32_94 = arith.constant 0 : i32
    %149 = arith.cmpi ne, %148, %c0_i32_94 : i32
    scf.if %149 {
      %150 = vector.broadcast %122 : f32 to vector<8x128xf32>
      %151 = arith.subf %7, %150 : vector<8x128xf32>
      %152 = vector.broadcast %123 : f32 to vector<8x128xf32>
      %153 = arith.subf %5, %152 : vector<8x128xf32>
      %154 = vector.broadcast %130 : f32 to vector<8x128xf32>
      %155 = arith.mulf %151, %154 : vector<8x128xf32>
      %156 = vector.broadcast %131 : f32 to vector<8x128xf32>
      %157 = arith.mulf %153, %156 : vector<8x128xf32>
      %158 = arith.addf %155, %157 : vector<8x128xf32>
      %159 = vector.broadcast %136 : f32 to vector<8x128xf32>
      %160 = arith.mulf %158, %159 : vector<8x128xf32>
      %cst_95 = arith.constant 0.000000e+00 : f32
      %cst_96 = arith.constant 1.000000e+00 : f32
      %161 = vector.broadcast %cst_95 : f32 to vector<8x128xf32>
      %162 = arith.maximumf %161, %160 : vector<8x128xf32>
      %163 = vector.broadcast %cst_96 : f32 to vector<8x128xf32>
      %164 = arith.minimumf %163, %162 : vector<8x128xf32>
      %165 = vector.broadcast %130 : f32 to vector<8x128xf32>
      %166 = arith.mulf %164, %165 : vector<8x128xf32>
      %167 = arith.subf %151, %166 : vector<8x128xf32>
      %168 = vector.broadcast %131 : f32 to vector<8x128xf32>
      %169 = arith.mulf %164, %168 : vector<8x128xf32>
      %170 = arith.subf %153, %169 : vector<8x128xf32>
      %171 = arith.mulf %167, %167 : vector<8x128xf32>
      %172 = arith.mulf %170, %170 : vector<8x128xf32>
      %173 = arith.addf %171, %172 : vector<8x128xf32>
      %174 = vector.broadcast %137 : f32 to vector<8x128xf32>
      %175 = arith.cmpf ole, %173, %174 : vector<8x128xf32>
      %c0_97 = arith.constant 0 : index
      %c0_98 = arith.constant 0 : index
      %176 = vector.load %arg3[%c0_97, %c0_98] : memref<8x128xf32, #tpu.memory_space<vmem>>, vector<8x128xf32>
      %177 = vector.broadcast %128 : f32 to vector<8x128xf32>
      %178 = arith.select %175, %177, %176 : vector<8x128xi1>, vector<8x128xf32>
      %c0_99 = arith.constant 0 : index
      %c0_100 = arith.constant 0 : index
      %179 = vector.load %arg3[%c0_99, %c0_100] : memref<8x128xf32, #tpu.memory_space<vmem>>, vector<8x128xf32>
      tpu.vector_store %arg3[%c0_99, %c0_100], %178 {strides = array<i32>} : memref<8x128xf32, #tpu.memory_space<vmem>>, vector<8x128xf32>,
    } else {
    }
    return
  }
  func.func @transform_0(%arg0: i32) -> (i32, i32) {
    %c0_i32 = arith.constant 0 : i32
    %c0_i32_0 = arith.constant 0 : i32
    %c0_i32_1 = arith.constant 0 : i32
    return %c0_i32, %c0_i32_0 : i32, i32
  }
  func.func @transform_1(%arg0: i32) -> (i32, i32) {
    %c0_i32 = arith.constant 0 : i32
    %c0_i32_0 = arith.constant 0 : i32
    return %arg0, %c0_i32 : i32, i32
  }
  func.func @transform_2(%arg0: i32) -> (i32, i32) {
    %c0_i32 = arith.constant 0 : i32
    %c0_i32_0 = arith.constant 0 : i32
    return %arg0, %c0_i32 : i32, i32
  }
}

</mosaic_0001>

<bundles_post_ra>
// kernel: tpu_custom_call.1
= control target key start
LH: loop header
LB: loop body
LE: loop exit
PB: predicated region body
PF: predicated region fallthrough
CT: control target
= control target key end

     0   :  { %s1278_s0 = inlined_call_operand.vmem [shape: f32[5,8], index: 0, kind: input, shape index: {}]   ;;  %s1279_s1 = inlined_call_operand.hbm [shape: f32[16,128], index: 1, kind: input, shape index: {}, may-alias: {1,2}]   ;;  %s1280_s2 = inlined_call_operand.hbm [shape: f32[16,128], index: 2, kind: output, shape index: {}, may-alias: {1,2}]  }
   0x1   :  { %1283 = sst [smem:[#allocation13_spill]] %s1278_s0 }
   0x2   :  { %1284 = sst [smem:[#allocation14_spill]] %s1279_s1 }
   0x3   :  { %7 = vsyncpa [#allocation5], 0 }
   0x4   :  { %8 = vsyncpa [#allocation3], 0 }
   0x5   :  { %10 = vsyncpa [#allocation3 + $0x1], 0 }
   0x6   :  { %11 = vsyncpa [#allocation4], 0 }
   0x7   :  { %13 = vsyncpa [#allocation4 + $0x1], 0  ;;  %s897_s9 = smov 0   ;;  %s899_s10 = smov 0  }
   0x8   :  { %s901_s11 = smov 0   ;;  %s903_s12 = smov 0  }
   0x9 LB: > { %1285 = sst [smem:[#allocation11_spill]] %s874_s11  ;;  %s918_s13 = sadd.s32 4294967295, %s878_s12   ;;  %s878_s12 = sphi %s903_s12, %s1305_s12   ;;  %s874_s11 = sphi %s901_s11, %s1302_s11   ;;  %s870_s10 = sphi %s899_s10, %s1304_s10   ;;  %s866_s9 = sphi %s897_s9, %s1303_s9  }
   0xa   : > { %s636_s14 = sadd.s32 4294967294, %s878_s12   ;;  %p60_p0 = scmp.ne.s32.totalorder %s870_s10, %s866_s9 }
   0xb   : > { %p61_p1 = scmp.eq.s32.totalorder %s918_s13, 0  ;;  %p84_p2 = scmp.eq.s32.totalorder %s918_s13, 1 }
   0xc   : > { %p90_p3 = scmp.eq.s32.totalorder %s636_s14, 1  ;;  %p637_p5 = scmp.ge.s32.totalorder %s878_s12, 1 }
   0xd   : > { %p927_p4 = por %p61_p1, %p60_p0  ;;  %p97_p7 = scmp.lt.s32.totalorder %s878_s12, 3 }
   0xe   : > { %p932_p6 = por %p90_p3, %p60_p0  ;;  %s1288_s0 = sld [smem:[#allocation13_spill]] }
   0xf   : > { %p940_p8 = pnand %p637_p5, %p97_p7  ;;  %s948_s21 = sadd.s32 1, %s878_s12  }
  0x10   : > { %s44_s22 = ssub.s32 %s878_s12, %s948_s21  ;;  %s47_s23 = sadd.s32 1, %s874_s11 }
  0x11   : > { %p703_p10 = pneg %p940_p8  ;;  %p45_p12 = scmp.eq.s32.totalorder %s44_s22, 0 }
  0x12   : > { %p54_p13 = scmp.ne.s32.totalorder %s874_s11, %s870_s10  ;;  %s880_s24 = smov [#allocation2]  }
  0x13   : > { %p704_p11 = pnand %p703_p10, %p61_p1  ;;  %p55_p0 = scmp.eq.s32.totalorder %s878_s12, 0 }
  0x14   : > { %s109_s19 = sshll.u32 %s1288_s0, 4  ;;  %p963_p3 = por %p84_p2, %p54_p13  ;;  %s110_s19 = int_to_ptr.vmem [resolvable:$true] %s109_s19 }
  0x15   : > { %706 = dma.vmem_to_smem (!%p704_p11), %s110_s19, 128, %s880_s24, [#allocation5]  }
  0x16   : > { %s958_s25 = scalar_select %p45_p12, %s874_s11, %s47_s23  }
  0x17   : > { %s120_s27 = sand.u32 1, %s874_s11   ;;  %p56_p5 = por %p55_p0, %p54_p13 }
  0x18   : > { %1290 = sst [smem:[#allocation12_spill]] %s958_s25  ;;  %p716_p7 = scmp.lt.s32.totalorder %s878_s12, 2 }
  0x19   : > { %s640_s28 = sshll.u32 %s120_s27, 3  ;;  %s641_s29 = sshll.u32 %s878_s12, 3 }
  0x1a   : > { %s1292_s1 = sld [smem:[#allocation14_spill]]  ;;  %s124_s6 = scalar_lea.vmem [#allocation6], %s640_s28 }
  0x1b   : > { %s132_s7 = sshll.u32 %s124_s6, 4  ;;  %p973_p10 = pnand %p716_p7, %p56_p5  ;;  %s133_s7 = int_to_ptr.vmem [resolvable:$true] %s132_s7 }
  0x1c   : > { %s121_s14 = scalar_lea.sflag [#allocation3], %s120_s27 }
  0x1d   : > { %p782_p11 = pneg %p973_p10 }
  0x20   : > { %s128_s4 = scalar_lea.hbm %s1292_s1, %s641_s29  ;;  %s785_s23 = scalar_lea.hbm %s1292_s1, 16 }
  0x21   : > { %s130_s5 = sshll.u32 %s128_s4, 4  ;;  %s131_s5 = int_to_ptr.hbm [resolvable:$true] %s130_s5 }
  0x22   : > { %s778_s17 = sshra.s32 %s131_s5, 4  ;;  %s779_s17 = int_to_ptr.hbm [resolvable:$true] %s778_s17 }
  0x23   : > { %s780_s18 = scalar_lea.hbm %s779_s17, 8  ;;  %p786_p0 = scmp.lt.s32.totalorder %s779_s17, %s1292_s1 }
  0x24   : > { %p781_p2 = scmp.ne.s32.totalorder %s779_s17, %s780_s18  ;;  %p787_p5 = scmp.lt.s32.totalorder %s785_s23, %s780_s18 }
  0x26   : > { %p783_p12 = pnand %p782_p11, %p781_p2  ;;  %p788_p7 = por %p787_p5, %p786_p0 }
  0x28   : > { %p784_p13 = pneg %p783_p12 }
  0x2a   : > { %p789_p9 = pnand %p788_p7, %p784_p13 }
  0x2c   : > { %792 = shalt.err (!%p789_p9)
}
  0x2d   : > { %710 = dma.hbm_to_vmem [thread:$0]  (!%p973_p10), %s131_s5, 128, %s133_s7, %s121_s14  }
  0x2e   : > { %141 = sbr.rel (%p940_p8) target bundleno = 619 (0x26b), region = 28 }
  0x33   : > { %853 = dma.done.wait (%p61_p1), [#allocation5], 128  }
  0x34   : > { %855 = vsyncadd (%p61_p1), [#allocation5], 4294967168  ;;  %s994_s27 = sand.u32 1, %s870_s10  }
  0x35   : > { %s644_s29 = sshll.u32 %s994_s27, 3  ;;  %s149_s30 = scalar_lea.sflag [#allocation3], %s994_s27 }
  0x36   : > { %s152_s3 = scalar_lea.vmem [#allocation6], %s644_s29 }
  0x37   : > { %857 = dma.done.wait (%p927_p4), %s149_s30, 128  }
  0x38   : > { %859 = vsyncadd (%p927_p4), %s149_s30, 4294967168 }
  0x39   : > { %158 = sfence }
  0x3a   : > { %s1281_s20 = sshll.u32 %s918_s13, 3  ;;  %v177_v0 = vlaneseq  ;;  %v185_v1 = vld [vmem:[%s152_s3] sm:$0xff]  ;;  %s1007_s5 = scalar_lea.vmem [#allocation7], %s644_s29 }
  0x3b   : > { %s1005_s4 = scvt.s32.f32 %s1281_s20  ;;  %186 = vst [vmem:[%s1007_s5] sm:$0xff] %v185_v1  ;;  %s1010_s6 = sld [smem:[#allocation2]] }
  0x3c   : > { %v178_v2 = vshrl.u32 %v177_v0, 7  ;;  %v183_v3 = vand.u32 127, %v177_v0  ;;  %s1012_s15 = sld [smem:[#allocation2 + $0x1]]  ;;  %s881_s25 = smov 1e-06  }
  0x3d   : > { %v180_v4 = vstv %s1005_s4  ;;  %s648_s7 = sld [smem:[#allocation2 + $0x2]] }
  0x3e   : > { %v179_v5 = vcvt.s32.f32 %v178_v2  ;;  %v1015_v6 = vcvt.s32.f32 %v183_v3  ;;  %s649_s8 = sld [smem:[#allocation2 + $0x3]] }
  0x3f   : > { %s650_s14 = sld [smem:[#allocation2 + $0x4]] }
  0x40   : > { %v1017_v7 = vadd.f32 %v180_v4, %v179_v5  ;;  %s1019_s17 = sld [smem:[#allocation2 + $0x5]] }
  0x41   : > { %s652_s18 = sld [smem:[#allocation2 + $0x6]] }
  0x42   : > { %s1022_s19 = sadd.f32 7.0, %s1005_s4 }
  0x43   : > { %s1025_s22 = ssub.f32 %s648_s7, %s1010_s6 }
  0x44   : > { %s1028_s23 = ssub.f32 %s649_s8, %s1012_s15  ;;  %s218_s24 = smin.f32 %s649_s8, %s1012_s15 }
  0x45   : > { %s1031_s28 = smul.f32 0.5, %s650_s14  ;;  %s220_s29 = smax.f32 %s649_s8, %s1012_s15 }
  0x46   : > { %s197_s30 = smul.f32 %s1025_s22, %s1025_s22 }
  0x47   : > { %s198_s3 = smul.f32 %s1028_s23, %s1028_s23  ;;  %s219_s20 = ssub.f32 %s218_s24, %s1031_s28 }
  0x48   : > { %s217_s0 = smul.f32 %s1031_s28, %s1031_s28  ;;  %s221_s7 = sadd.f32 %s220_s29, %s1031_s28 }
  0x49   : > { %s199_s1 = sadd.f32 %s198_s3, %s197_s30  ;;  %p224_p1 = scmp.le.f32.partialorder %s219_s20, %s1022_s19 }
  0x4a   : > { %p222_p4 = scmp.ge.f32.partialorder %s221_s7, %s1005_s4  ;;  %p227_p9 = scmp.gt.f32.partialorder %s652_s18, 0.5 }
  0x4b   : > { %s200_s11 = smax.f32 %s881_s25, %s199_s1 }
  0x4c   : > { %v201_v8 = vstv %s200_s11  ;;  %p225_p8 = pnand %p224_p1, %p222_p4 }
  0x4d   : > { %753 = vrcp.f32 %v201_v8  ;;  %v213_v11 = vand.u32 2147483648, %v201_v8  ;;  %vm207_vm0 = vweird.f32 %v201_v8  ;;  %v211_v13 = vand.u32 2147483647, %v201_v8 }
  0x4e   : > { %p226_p10 = pneg %p225_p8 }
  0x4f   : > { %v214_v15 = vor.u32 1.1754944e-38, %v213_v11  ;;  %vm212_vm3 = vcmp.eq.f32.partialorder %v211_v13, 8.507059e+37 }
  0x50   : > { %p1045_p2 = pnand %p227_p9, %p226_p10 }
  0x53   : > { %v754_v9 = vpop.eup %753 }
  0x54   : > { %v203_v10 = vmul.f32 %v754_v9, %v201_v8  ;;  %vm208_vm1 = vweird.f32 %v754_v9 }
  0x55   : > { %vm209_vm2 = vmor %vm207_vm0, %vm208_vm1 }
  0x56   : > { %v204_v12 = vsub.f32 1.0, %v203_v10 }
  0x58   : > { %v205_v14 = vmul.f32 %v754_v9, %v204_v12 }
  0x5a   : > { %v206_v16 = vadd.f32 %v754_v9, %v205_v14 }
  0x5c   : > { %v210_v17 = vsel %vm209_vm2, %v754_v9, %v206_v16 }
  0x5d   : > { %v215_v18 = vsel %vm212_vm3, %v214_v15, %v210_v17 }
  0x5e   : > { %685 = vpush %v215_v18 }
  0x8b   : > { %231 = sbr.rel (%p1045_p2) target bundleno = 168 (0xa8), region = 40 }
  0x8f   : > { %s686_s1 = spop %685 }
  0x90   : > { %v232_v19 = vstv %s1010_s6  ;;  %v234_v20 = vstv %s1012_s15  ;;  %v236_v21 = vstv %s1025_s22  ;;  %v238_v22 = vstv %s1028_s23 }
  0x91   : > { %v233_v23 = vsub.f32 %v1015_v6, %v232_v19  ;;  %v235_v24 = vsub.f32 %v1017_v7, %v234_v20  ;;  %v241_v27 = vstv %s686_s1  ;;  %v252_v38 = vstv %s217_s0  ;;  %v254_v40 = vld [vmem:[%s1007_s5] sm:$0xff] }
  0x92   : > { %v255_v41 = vstv %s1019_s17 }
  0x93   : > { %v237_v25 = vmul.f32 %v236_v21, %v233_v23  ;;  %v239_v26 = vmul.f32 %v238_v22, %v235_v24 }
  0x95   : > { %v240_v28 = vadd.f32 %v239_v26, %v237_v25 }
  0x97   : > { %v242_v29 = vmul.f32 %v241_v27, %v240_v28 }
  0x99   : > { %v243_v30 = vmax.f32 %v242_v29, 0.0 }
  0x9b   : > { %v244_v31 = vmin.f32 %v243_v30, 1.0 }
  0x9d   : > { %v245_v32 = vmul.f32 %v244_v31, %v236_v21  ;;  %v247_v33 = vmul.f32 %v244_v31, %v238_v22 }
  0x9f   : > { %v246_v34 = vsub.f32 %v233_v23, %v245_v32  ;;  %v248_v35 = vsub.f32 %v235_v24, %v247_v33 }
  0xa1   : > { %v249_v36 = vmul.f32 %v246_v34, %v246_v34  ;;  %v250_v37 = vmul.f32 %v248_v35, %v248_v35 }
  0xa3   : > { %v251_v39 = vadd.f32 %v250_v37, %v249_v36 }
  0xa5   : > { %vm253_vm4 = vcmp.le.f32.partialorder %v251_v39, %v252_v38 }
  0xa6   : > { %v256_v42 = vsel %vm253_vm4, %v255_v41, %v254_v40 }
  0xa7   : > { %257 = vst [vmem:[%s1007_s5] sm:$0xff] %v256_v42 }
  0xa8 PF: > { %s1063_s11 = sld [smem:[#allocation2 + $0x80]] }
  0xa9   : > { %s1065_s20 = sld [smem:[#allocation2 + $0x81]] }
  0xaa   : > { %s655_s6 = sld [smem:[#allocation2 + $0x82]] }
  0xab   : > { %s656_s15 = sld [smem:[#allocation2 + $0x83]] }
  0xac   : > { %s657_s0 = sld [smem:[#allocation2 + $0x84]] }
  0xad   : > { %s1067_s14 = sld [smem:[#allocation2 + $0x85]] }
  0xae   : > { %s659_s17 = sld [smem:[#allocation2 + $0x86]] }
  0xb0   : > { %s1070_s18 = ssub.f32 %s655_s6, %s1063_s11 }
  0xb1   : > { %s1073_s22 = ssub.f32 %s656_s15, %s1065_s20  ;;  %s289_s23 = smin.f32 %s656_s15, %s1065_s20 }
  0xb2   : > { %s1076_s24 = smul.f32 0.5, %s657_s0  ;;  %s291_s28 = smax.f32 %s656_s15, %s1065_s20 }
  0xb3   : > { %s268_s29 = smul.f32 %s1070_s18, %s1070_s18 }
  0xb4   : > { %s269_s30 = smul.f32 %s1073_s22, %s1073_s22  ;;  %s290_s3 = ssub.f32 %s289_s23, %s1076_s24 }
  0xb5   : > { %s288_s7 = smul.f32 %s1076_s24, %s1076_s24  ;;  %s292_s8 = sadd.f32 %s291_s28, %s1076_s24 }
  0xb6   : > { %s270_s1 = sadd.f32 %s269_s30, %s268_s29  ;;  %p294_p11 = scmp.le.f32.partialorder %s290_s3, %s1022_s19 }
  0xb7   : > { %p293_p12 = scmp.ge.f32.partialorder %s292_s8, %s1005_s4  ;;  %p297_p0 = scmp.gt.f32.partialorder %s659_s17, 0.5 }
  0xb8   : > { %s271_s6 = smax.f32 %s881_s25, %s270_s1 }
  0xb9   : > { %v272_v43 = vstv %s271_s6  ;;  %p295_p13 = pnand %p294_p11, %p293_p12 }
  0xba   : > { %755 = vrcp.f32 %v272_v43  ;;  %v284_v46 = vand.u32 2147483648, %v272_v43  ;;  %vm278_vm5 = vweird.f32 %v272_v43  ;;  %v282_v48 = vand.u32 2147483647, %v272_v43 }
  0xbb   : > { %p296_p5 = pneg %p295_p13 }
  0xbc   : > { %v285_v50 = vor.u32 1.1754944e-38, %v284_v46  ;;  %vm283_vm8 = vcmp.eq.f32.partialorder %v282_v48, 8.507059e+37 }
  0xbd   : > { %p1090_p7 = pnand %p297_p0, %p296_p5 }
  0xc0   : > { %v756_v44 = vpop.eup %755 }
  0xc1   : > { %v274_v45 = vmul.f32 %v756_v44, %v272_v43  ;;  %vm279_vm6 = vweird.f32 %v756_v44 }
  0xc2   : > { %vm280_vm7 = vmor %vm278_vm5, %vm279_vm6 }
  0xc3   : > { %v275_v47 = vsub.f32 1.0, %v274_v45 }
  0xc5   : > { %v276_v49 = vmul.f32 %v756_v44, %v275_v47 }
  0xc7   : > { %v277_v51 = vadd.f32 %v756_v44, %v276_v49 }
  0xc9   : > { %v281_v52 = vsel %vm280_vm7, %v756_v44, %v277_v51 }
  0xca   : > { %v286_v53 = vsel %vm283_vm8, %v285_v50, %v281_v52 }
  0xcb   : > { %687 = vpush %v286_v53 }
  0xf8   : > { %301 = sbr.rel (%p1090_p7) target bundleno = 277 (0x115), region = 44 }
  0xfc   : > { %s688_s0 = spop %687 }
  0xfd   : > { %v302_v54 = vstv %s1063_s11  ;;  %v304_v55 = vstv %s1065_s20  ;;  %v306_v56 = vstv %s1070_s18  ;;  %v308_v57 = vstv %s1073_s22 }
  0xfe   : > { %v303_v58 = vsub.f32 %v1015_v6, %v302_v54  ;;  %v305_v59 = vsub.f32 %v1017_v7, %v304_v55  ;;  %v311_v62 = vstv %s688_s0  ;;  %v322_v11 = vstv %s288_s7  ;;  %v324_v13 = vld [vmem:[%s1007_s5] sm:$0xff] }
  0xff   : > { %v325_v14 = vstv %s1067_s14 }
 0x100   : > { %v307_v60 = vmul.f32 %v306_v56, %v303_v58  ;;  %v309_v61 = vmul.f32 %v308_v57, %v305_v59 }
 0x102   : > { %v310_v63 = vadd.f32 %v309_v61, %v307_v60 }
 0x104   : > { %v312_v0 = vmul.f32 %v311_v62, %v310_v63 }
 0x106   : > { %v313_v1 = vmax.f32 %v312_v0, 0.0 }
 0x108   : > { %v314_v2 = vmin.f32 %v313_v1, 1.0 }
 0x10a   : > { %v315_v3 = vmul.f32 %v314_v2, %v306_v56  ;;  %v317_v4 = vmul.f32 %v314_v2, %v308_v57 }
 0x10c   : > { %v316_v5 = vsub.f32 %v303_v58, %v315_v3  ;;  %v318_v8 = vsub.f32 %v305_v59, %v317_v4 }
 0x10e   : > { %v319_v9 = vmul.f32 %v316_v5, %v316_v5  ;;  %v320_v10 = vmul.f32 %v318_v8, %v318_v8 }
 0x110   : > { %v321_v12 = vadd.f32 %v320_v10, %v319_v9 }
 0x112   : > { %vm323_vm9 = vcmp.le.f32.partialorder %v321_v12, %v322_v11 }
 0x113   : > { %v326_v15 = vsel %vm323_vm9, %v325_v14, %v324_v13 }
 0x114   : > { %327 = vst [vmem:[%s1007_s5] sm:$0xff] %v326_v15 }
 0x115 PF: > { %s1108_s11 = sld [smem:[#allocation2 + $0x100]] }
 0x116   : > { %s1110_s20 = sld [smem:[#allocation2 + $0x101]] }
 0x117   : > { %s662_s17 = sld [smem:[#allocation2 + $0x102]] }
 0x118   : > { %s663_s18 = sld [smem:[#allocation2 + $0x103]] }
 0x119   : > { %s664_s22 = sld [smem:[#allocation2 + $0x104]] }
 0x11a   : > { %s1112_s23 = sld [smem:[#allocation2 + $0x105]] }
 0x11b   : > { %s666_s14 = sld [smem:[#allocation2 + $0x106]] }
 0x11d   : > { %s1115_s24 = ssub.f32 %s662_s17, %s1108_s11 }
 0x11e   : > { %s1118_s28 = ssub.f32 %s663_s18, %s1110_s20  ;;  %s359_s29 = smin.f32 %s663_s18, %s1110_s20 }
 0x11f   : > { %s1121_s30 = smul.f32 0.5, %s664_s22  ;;  %s361_s3 = smax.f32 %s663_s18, %s1110_s20 }
 0x120   : > { %s338_s7 = smul.f32 %s1115_s24, %s1115_s24 }
 0x121   : > { %s339_s8 = smul.f32 %s1118_s28, %s1118_s28  ;;  %s360_s1 = ssub.f32 %s359_s29, %s1121_s30 }
 0x122   : > { %s358_s6 = smul.f32 %s1121_s30, %s1121_s30  ;;  %s362_s15 = sadd.f32 %s361_s3, %s1121_s30 }
 0x123   : > { %s340_s0 = sadd.f32 %s339_s8, %s338_s7  ;;  %p364_p1 = scmp.le.f32.partialorder %s360_s1, %s1022_s19 }
 0x124   : > { %p363_p4 = scmp.ge.f32.partialorder %s362_s15, %s1005_s4  ;;  %p367_p9 = scmp.gt.f32.partialorder %s666_s14, 0.5 }
 0x125   : > { %s341_s17 = smax.f32 %s881_s25, %s340_s0 }
 0x126   : > { %v342_v16 = vstv %s341_s17  ;;  %p365_p8 = pnand %p364_p1, %p363_p4 }
 0x127   : > { %757 = vrcp.f32 %v342_v16  ;;  %v354_v19 = vand.u32 2147483648, %v342_v16  ;;  %vm348_vm10 = vweird.f32 %v342_v16  ;;  %v352_v21 = vand.u32 2147483647, %v342_v16 }
 0x128   : > { %p366_p10 = pneg %p365_p8 }
 0x129   : > { %v355_v23 = vor.u32 1.1754944e-38, %v354_v19  ;;  %vm353_vm13 = vcmp.eq.f32.partialorder %v352_v21, 8.507059e+37 }
 0x12a   : > { %p1135_p2 = pnand %p367_p9, %p366_p10 }
 0x12d   : > { %v758_v17 = vpop.eup %757 }
 0x12e   : > { %v344_v18 = vmul.f32 %v758_v17, %v342_v16  ;;  %vm349_vm11 = vweird.f32 %v758_v17 }
 0x12f   : > { %vm350_vm12 = vmor %vm348_vm10, %vm349_vm11 }
 0x130   : > { %v345_v20 = vsub.f32 1.0, %v344_v18 }
 0x132   : > { %v346_v22 = vmul.f32 %v758_v17, %v345_v20 }
 0x134   : > { %v347_v24 = vadd.f32 %v758_v17, %v346_v22 }
 0x136   : > { %v351_v25 = vsel %vm350_vm12, %v758_v17, %v347_v24 }
 0x137   : > { %v356_v26 = vsel %vm353_vm13, %v355_v23, %v351_v25 }
 0x138   : > { %689 = vpush %v356_v26 }
 0x165   : > { %371 = sbr.rel (%p1135_p2) target bundleno = 386 (0x182), region = 48 }
 0x169   : > { %s690_s22 = spop %689 }
 0x16a   : > { %v372_v27 = vstv %s1108_s11  ;;  %v374_v28 = vstv %s1110_s20  ;;  %v376_v29 = vstv %s1115_s24  ;;  %v378_v30 = vstv %s1118_s28 }
 0x16b   : > { %v373_v31 = vsub.f32 %v1015_v6, %v372_v27  ;;  %v375_v32 = vsub.f32 %v1017_v7, %v374_v28  ;;  %v381_v35 = vstv %s690_s22  ;;  %v392_v46 = vstv %s358_s6  ;;  %v394_v48 = vld [vmem:[%s1007_s5] sm:$0xff] }
 0x16c   : > { %v395_v49 = vstv %s1112_s23 }
 0x16d   : > { %v377_v33 = vmul.f32 %v376_v29, %v373_v31  ;;  %v379_v34 = vmul.f32 %v378_v30, %v375_v32 }
 0x16f   : > { %v380_v36 = vadd.f32 %v379_v34, %v377_v33 }
 0x171   : > { %v382_v37 = vmul.f32 %v381_v35, %v380_v36 }
 0x173   : > { %v383_v38 = vmax.f32 %v382_v37, 0.0 }
 0x175   : > { %v384_v39 = vmin.f32 %v383_v38, 1.0 }
 0x177   : > { %v385_v40 = vmul.f32 %v384_v39, %v376_v29  ;;  %v387_v41 = vmul.f32 %v384_v39, %v378_v30 }
 0x179   : > { %v386_v42 = vsub.f32 %v373_v31, %v385_v40  ;;  %v388_v43 = vsub.f32 %v375_v32, %v387_v41 }
 0x17b   : > { %v389_v44 = vmul.f32 %v386_v42, %v386_v42  ;;  %v390_v45 = vmul.f32 %v388_v43, %v388_v43 }
 0x17d   : > { %v391_v47 = vadd.f32 %v390_v45, %v389_v44 }
 0x17f   : > { %vm393_vm14 = vcmp.le.f32.partialorder %v391_v47, %v392_v46 }
 0x180   : > { %v396_v50 = vsel %vm393_vm14, %v395_v49, %v394_v48 }
 0x181   : > { %397 = vst [vmem:[%s1007_s5] sm:$0xff] %v396_v50 }
 0x182 PF: > { %s1153_s11 = sld [smem:[#allocation2 + $0x180]] }
 0x183   : > { %s1155_s20 = sld [smem:[#allocation2 + $0x181]] }
 0x184   : > { %s669_s14 = sld [smem:[#allocation2 + $0x182]] }
 0x185   : > { %s670_s24 = sld [smem:[#allocation2 + $0x183]] }
 0x186   : > { %s671_s28 = sld [smem:[#allocation2 + $0x184]] }
 0x187   : > { %s1157_s29 = sld [smem:[#allocation2 + $0x185]] }
 0x188   : > { %s673_s23 = sld [smem:[#allocation2 + $0x186]] }
 0x18a   : > { %s1160_s30 = ssub.f32 %s669_s14, %s1153_s11 }
 0x18b   : > { %s1163_s3 = ssub.f32 %s670_s24, %s1155_s20  ;;  %s429_s7 = smin.f32 %s670_s24, %s1155_s20 }
 0x18c   : > { %s1166_s8 = smul.f32 0.5, %s671_s28  ;;  %s431_s1 = smax.f32 %s670_s24, %s1155_s20 }
 0x18d   : > { %s408_s6 = smul.f32 %s1160_s30, %s1160_s30 }
 0x18e   : > { %s409_s15 = smul.f32 %s1163_s3, %s1163_s3  ;;  %s430_s0 = ssub.f32 %s429_s7, %s1166_s8 }
 0x18f   : > { %s428_s17 = smul.f32 %s1166_s8, %s1166_s8  ;;  %s432_s18 = sadd.f32 %s431_s1, %s1166_s8 }
 0x190   : > { %s410_s22 = sadd.f32 %s409_s15, %s408_s6  ;;  %p434_p11 = scmp.le.f32.partialorder %s430_s0, %s1022_s19 }
 0x191   : > { %p433_p12 = scmp.ge.f32.partialorder %s432_s18, %s1005_s4  ;;  %p437_p0 = scmp.gt.f32.partialorder %s673_s23, 0.5 }
 0x192   : > { %s411_s14 = smax.f32 %s881_s25, %s410_s22 }
 0x193   : > { %v412_v51 = vstv %s411_s14  ;;  %p435_p13 = pnand %p434_p11, %p433_p12 }
 0x194   : > { %759 = vrcp.f32 %v412_v51  ;;  %v424_v54 = vand.u32 2147483648, %v412_v51  ;;  %vm418_vm15 = vweird.f32 %v412_v51  ;;  %v422_v56 = vand.u32 2147483647, %v412_v51 }
 0x195   : > { %p436_p5 = pneg %p435_p13 }
 0x196   : > { %v425_v58 = vor.u32 1.1754944e-38, %v424_v54  ;;  %vm423_vm2 = vcmp.eq.f32.partialorder %v422_v56, 8.507059e+37 }
 0x197   : > { %p1180_p7 = pnand %p437_p0, %p436_p5 }
 0x19a   : > { %v760_v52 = vpop.eup %759 }
 0x19b   : > { %v414_v53 = vmul.f32 %v760_v52, %v412_v51  ;;  %vm419_vm0 = vweird.f32 %v760_v52 }
 0x19c   : > { %vm420_vm1 = vmor %vm418_vm15, %vm419_vm0 }
 0x19d   : > { %v415_v55 = vsub.f32 1.0, %v414_v53 }
 0x19f   : > { %v416_v57 = vmul.f32 %v760_v52, %v415_v55 }
 0x1a1   : > { %v417_v59 = vadd.f32 %v760_v52, %v416_v57 }
 0x1a3   : > { %v421_v60 = vsel %vm420_vm1, %v760_v52, %v417_v59 }
 0x1a4   : > { %v426_v61 = vsel %vm423_vm2, %v425_v58, %v421_v60 }
 0x1a5   : > { %691 = vpush %v426_v61 }
 0x1d2   : > { %441 = sbr.rel (%p1180_p7) target bundleno = 495 (0x1ef), region = 52 }
 0x1d6   : > { %s692_s28 = spop %691 }
 0x1d7   : > { %v442_v62 = vstv %s1153_s11  ;;  %v444_v63 = vstv %s1155_s20  ;;  %v446_v0 = vstv %s1160_s30  ;;  %v448_v1 = vstv %s1163_s3 }
 0x1d8   : > { %v443_v2 = vsub.f32 %v1015_v6, %v442_v62  ;;  %v445_v3 = vsub.f32 %v1017_v7, %v444_v63  ;;  %v451_v8 = vstv %s692_s28  ;;  %v462_v19 = vstv %s428_s17  ;;  %v464_v21 = vld [vmem:[%s1007_s5] sm:$0xff] }
 0x1d9   : > { %v465_v22 = vstv %s1157_s29 }
 0x1da   : > { %v447_v4 = vmul.f32 %v446_v0, %v443_v2  ;;  %v449_v5 = vmul.f32 %v448_v1, %v445_v3 }
 0x1dc   : > { %v450_v9 = vadd.f32 %v449_v5, %v447_v4 }
 0x1de   : > { %v452_v10 = vmul.f32 %v451_v8, %v450_v9 }
 0x1e0   : > { %v453_v11 = vmax.f32 %v452_v10, 0.0 }
 0x1e2   : > { %v454_v12 = vmin.f32 %v453_v11, 1.0 }
 0x1e4   : > { %v455_v13 = vmul.f32 %v454_v12, %v446_v0  ;;  %v457_v14 = vmul.f32 %v454_v12, %v448_v1 }
 0x1e6   : > { %v456_v15 = vsub.f32 %v443_v2, %v455_v13  ;;  %v458_v16 = vsub.f32 %v445_v3, %v457_v14 }
 0x1e8   : > { %v459_v17 = vmul.f32 %v456_v15, %v456_v15  ;;  %v460_v18 = vmul.f32 %v458_v16, %v458_v16 }
 0x1ea   : > { %v461_v20 = vadd.f32 %v460_v18, %v459_v17 }
 0x1ec   : > { %vm463_vm3 = vcmp.le.f32.partialorder %v461_v20, %v462_v19 }
 0x1ed   : > { %v466_v23 = vsel %vm463_vm3, %v465_v22, %v464_v21 }
 0x1ee   : > { %467 = vst [vmem:[%s1007_s5] sm:$0xff] %v466_v23 }
 0x1ef PF: > { %s1198_s11 = sld [smem:[#allocation2 + $0x200]] }
 0x1f0   : > { %s1200_s20 = sld [smem:[#allocation2 + $0x201]] }
 0x1f1   : > { %s676_s23 = sld [smem:[#allocation2 + $0x202]] }
 0x1f2   : > { %s677_s30 = sld [smem:[#allocation2 + $0x203]] }
 0x1f3   : > { %s678_s3 = sld [smem:[#allocation2 + $0x204]] }
 0x1f4   : > { %s1202_s7 = sld [smem:[#allocation2 + $0x205]] }
 0x1f5   : > { %s680_s29 = sld [smem:[#allocation2 + $0x206]] }
 0x1f7   : > { %s1205_s8 = ssub.f32 %s676_s23, %s1198_s11 }
 0x1f8   : > { %s1208_s1 = ssub.f32 %s677_s30, %s1200_s20  ;;  %s499_s6 = smin.f32 %s677_s30, %s1200_s20 }
 0x1f9   : > { %s1211_s15 = smul.f32 0.5, %s678_s3  ;;  %s501_s0 = smax.f32 %s677_s30, %s1200_s20 }
 0x1fa   : > { %s478_s17 = smul.f32 %s1205_s8, %s1205_s8 }
 0x1fb   : > { %s479_s18 = smul.f32 %s1208_s1, %s1208_s1  ;;  %s500_s22 = ssub.f32 %s499_s6, %s1211_s15 }
 0x1fc   : > { %s498_s14 = smul.f32 %s1211_s15, %s1211_s15  ;;  %s502_s24 = sadd.f32 %s501_s0, %s1211_s15 }
 0x1fd   : > { %s480_s28 = sadd.f32 %s479_s18, %s478_s17  ;;  %p504_p1 = scmp.le.f32.partialorder %s500_s22, %s1022_s19 }
 0x1fe   : > { %p503_p4 = scmp.ge.f32.partialorder %s502_s24, %s1005_s4  ;;  %p507_p9 = scmp.gt.f32.partialorder %s680_s29, 0.5 }
 0x1ff   : > { %s481_s23 = smax.f32 %s881_s25, %s480_s28 }
 0x200   : > { %v482_v24 = vstv %s481_s23  ;;  %p505_p8 = pnand %p504_p1, %p503_p4 }
 0x201   : > { %761 = vrcp.f32 %v482_v24  ;;  %v494_v27 = vand.u32 2147483648, %v482_v24  ;;  %vm488_vm4 = vweird.f32 %v482_v24  ;;  %v492_v29 = vand.u32 2147483647, %v482_v24 }
 0x202   : > { %p506_p10 = pneg %p505_p8 }
 0x203   : > { %v495_v31 = vor.u32 1.1754944e-38, %v494_v27  ;;  %vm493_vm7 = vcmp.eq.f32.partialorder %v492_v29, 8.507059e+37 }
 0x204   : > { %p1225_p2 = pnand %p507_p9, %p506_p10 }
 0x207   : > { %v762_v25 = vpop.eup %761 }
 0x208   : > { %v484_v26 = vmul.f32 %v762_v25, %v482_v24  ;;  %vm489_vm5 = vweird.f32 %v762_v25 }
 0x209   : > { %vm490_vm6 = vmor %vm488_vm4, %vm489_vm5 }
 0x20a   : > { %v485_v28 = vsub.f32 1.0, %v484_v26 }
 0x20c   : > { %v486_v30 = vmul.f32 %v762_v25, %v485_v28 }
 0x20e   : > { %v487_v32 = vadd.f32 %v762_v25, %v486_v30 }
 0x210   : > { %v491_v33 = vsel %vm490_vm6, %v762_v25, %v487_v32 }
 0x211   : > { %v496_v34 = vsel %vm493_vm7, %v495_v31, %v491_v33 }
 0x212   : > { %693 = vpush %v496_v34 }
 0x23f   : > { %511 = sbr.rel (%p1225_p2) target bundleno = 604 (0x25c), region = 56 }
 0x243   : > { %s694_s25 = spop %693 }
 0x244   : > { %v512_v35 = vstv %s1198_s11  ;;  %v514_v36 = vstv %s1200_s20  ;;  %v516_v37 = vstv %s1205_s8  ;;  %v518_v38 = vstv %s1208_s1 }
 0x245   : > { %v513_v39 = vsub.f32 %v1015_v6, %v512_v35  ;;  %v515_v40 = vsub.f32 %v1017_v7, %v514_v36  ;;  %v521_v43 = vstv %s694_s25  ;;  %v532_v6 = vstv %s498_s14  ;;  %v534_v7 = vld [vmem:[%s1007_s5] sm:$0xff] }
 0x246   : > { %v535_v55 = vstv %s1202_s7 }
 0x247   : > { %v517_v41 = vmul.f32 %v516_v37, %v513_v39  ;;  %v519_v42 = vmul.f32 %v518_v38, %v515_v40 }
 0x249   : > { %v520_v44 = vadd.f32 %v519_v42, %v517_v41 }
 0x24b   : > { %v522_v45 = vmul.f32 %v521_v43, %v520_v44 }
 0x24d   : > { %v523_v46 = vmax.f32 %v522_v45, 0.0 }
 0x24f   : > { %v524_v47 = vmin.f32 %v523_v46, 1.0 }
 0x251   : > { %v525_v48 = vmul.f32 %v524_v47, %v516_v37  ;;  %v527_v49 = vmul.f32 %v524_v47, %v518_v38 }
 0x253   : > { %v526_v50 = vsub.f32 %v513_v39, %v525_v48  ;;  %v528_v51 = vsub.f32 %v515_v40, %v527_v49 }
 0x255   : > { %v529_v52 = vmul.f32 %v526_v50, %v526_v50  ;;  %v530_v53 = vmul.f32 %v528_v51, %v528_v51 }
 0x257   : > { %v531_v54 = vadd.f32 %v530_v53, %v529_v52 }
 0x259   : > { %vm533_vm8 = vcmp.le.f32.partialorder %v531_v54, %v532_v6 }
 0x25a   : > { %v536_v56 = vsel %vm533_vm8, %v535_v55, %v534_v7 }
 0x25b   : > { %537 = vst [vmem:[%s1007_s5] sm:$0xff] %v536_v56 }
 0x25c PF: > { %s1299_s4 = sshll.u32 %s918_s13, 3  ;;  %s551_s3 = sshll.u32 %s1007_s5, 4  ;;  %s552_s3 = int_to_ptr.vmem [resolvable:$true] %s551_s3 }
 0x25d   : > { %s549_s20 = scalar_lea.hbm %s1280_s2, %s1299_s4  ;;  %s539_s8 = scalar_lea.sflag [#allocation4], %s994_s27 }
 0x25e   : > { %s553_s29 = sshll.u32 %s549_s20, 4  ;;  %s828_s15 = scalar_lea.hbm %s1280_s2, 16  ;;  %s554_s29 = int_to_ptr.hbm [resolvable:$true] %s553_s29 }
 0x25f   : > { %s822_s1 = sshra.s32 %s554_s29, 4  ;;  %s823_s1 = int_to_ptr.hbm [resolvable:$true] %s822_s1 }
 0x260   : > { %s824_s7 = scalar_lea.hbm %s823_s1, 8  ;;  %p829_p0 = scmp.lt.s32.totalorder %s823_s1, %s1280_s2 }
 0x261   : > { %p825_p11 = scmp.ne.s32.totalorder %s823_s1, %s824_s7  ;;  %p830_p5 = scmp.lt.s32.totalorder %s828_s15, %s824_s7 }
 0x263   : > { %p826_p12 = pnand %p825_p11, %p963_p3  ;;  %p831_p7 = por %p830_p5, %p829_p0 }
 0x265   : > { %p827_p13 = pneg %p826_p12 }
 0x267   : > { %p832_p1 = pnand %p831_p7, %p827_p13 }
 0x269   : > { %835 = shalt.err (!%p832_p1)
}
 0x26a   : > { %701 = dma.vmem_to_hbm [thread:$0]  (%p963_p3), %s552_s3, 128, %s554_s29, %s539_s8  }
 0x26b PF: > { %s565_s27 = sand.u32 1, %s866_s9   ;;  %p1300_p4 = scmp.ge.s32.totalorder %s878_s12, 2 }
 0x26c   : > { %s566_s5 = scalar_lea.sflag [#allocation4], %s565_s27 }
 0x26d   : > { %p712_p8 = pnand %p1300_p4, %p932_p6 }
 0x26f   : > { %p713_p9 = pneg %p712_p8 }
 0x271   : > { %861 = dma.done.wait (%p713_p9), %s566_s5, 128  }
 0x272   : > { %863 = vsyncadd (%p713_p9), %s566_s5, 4294967168  ;;  %s1301_s18 = sld [smem:[#allocation11_spill]]  ;;  %p16_p10 = scmp.ge.s32.totalorder %s948_s21, 4  }
 0x273   : > { %s1302_s11 = sld [smem:[#allocation12_spill]]  ;;  %s1303_s9 = smov %s870_s10 }
 0x274   : > { %s1305_s12 = smov %s948_s21  ;;  %18 = sbr.rel (!%p16_p10) target bundleno = 9 (0x9), region = 98 }
 0x278   : > { %s1304_s10 = smov %s1301_s18 }
 0x279   :  { %572 = vsyncpa [#allocation3], 1 }
 0x27a   :  { %574 = vsyncpa [#allocation3 + $0x1], 1 }
 0x27b   :  { %575 = vsyncpa [#allocation4], 1 }
 0x27c   :  { %577 = vsyncpa [#allocation4 + $0x1], 1 }
 0x27d   :  { %578 = vsyncpa [#allocation5], 1 }
 0x27e   :  { %580 = vsyncpa [#allocation5 + $0x1], 1 }

</bundles_post_ra>
